<compile_context>
chip_gen: v6e
topology: v6e:2x2x1
jax: 0.10.0
libtpu: 0.0.40
codegen_flags: <defaults>
</compile_context>

<pallas_src>
import math

import numpy as np
import jax
import jax.numpy as jnp
from jax.experimental import pallas as pl
from jax.experimental.pallas import tpu as pltpu


# ----------------------------------------------------------------------------
# Diffusion schedule buffers (numpy float64 construction, mirrors the
# torch.float64 schedule math of GaussianDiffusion.__init__)
# ----------------------------------------------------------------------------
def cosine_beta_schedule(timesteps, s=0.008):
    steps = timesteps + 1
    x = np.linspace(0, timesteps, steps, dtype=np.float64)
    alphas_cumprod = np.cos((x / timesteps + s) / (1 + s) * math.pi * 0.5) ** 2
    alphas_cumprod = alphas_cumprod / alphas_cumprod[0]
    betas = 1 - alphas_cumprod[1:] / alphas_cumprod[:-1]
    return np.clip(betas, 0.0, 0.999)


class DiffusionBuffers:
    def __init__(self, timesteps=1000, p2_loss_weight_gamma=0.0, p2_loss_weight_k=1):
        betas = cosine_beta_schedule(timesteps)
        alphas = 1.0 - betas
        alphas_cumprod = np.cumprod(alphas)
        self.num_timesteps = int(timesteps)
        self.sqrt_alphas_cumprod = jnp.asarray(
            np.sqrt(alphas_cumprod), dtype=jnp.float32
        )
        self.sqrt_one_minus_alphas_cumprod = jnp.asarray(
            np.sqrt(1.0 - alphas_cumprod), dtype=jnp.float32
        )
        self.p2_loss_weight = jnp.asarray(
            (p2_loss_weight_k + alphas_cumprod / (1.0 - alphas_cumprod))
            ** (-p2_loss_weight_gamma),
            dtype=jnp.float32,
        )


# ----------------------------------------------------------------------------
# Pallas kernel: one (sample, HW-chunk) block per grid point.
# ----------------------------------------------------------------------------
def _gaussian_diffusion_kernel(
    coef_ref,    # SMEM (B, 3): [sqrt_acp[t], sqrt_1m_acp[t], p2_w[t]/(C*HW*B)]
    tbias_ref,   # VMEM (1, C, 1): time-embedding bias for this sample
    w_ref,       # VMEM (4, C, C): [w_c01, w_c02, w_f01, w_comb - I]
    c01_ref,     # VMEM (1, C, T)
    c02_ref,     # VMEM (1, C, T)
    f01_ref,     # VMEM (1, C, T)  ("noise")
    f02_ref,     # VMEM (1, C, T)  (x_0)
    comb_ref,    # VMEM (1, C, T) out: combined_fine_img_t (q_sample)
    loss_ref,    # VMEM (1, 1, 1, 1) out: weighted-L1 partial sum of this block
):
    b = pl.program_id(0)
    sa = coef_ref[b, 0]      # sqrt(alphas_cumprod[t_b])
    soma = coef_ref[b, 1]    # sqrt(1 - alphas_cumprod[t_b])
    wl = coef_ref[b, 2]      # p2_loss_weight[t_b] / (C*H*W*B)

    f01 = f01_ref[0]         # (C, T)
    f02 = f02_ref[0]         # (C, T)

    # diffusion_process / q_sample: x_t = sqrt(acp)*x_0 + sqrt(1-acp)*noise
    comb = sa * f02 + soma * f01
    comb_ref[0] = comb

    # Synthetic denoiser (1x1 conv over 4 streams + time bias), with the
    # `- target` of the L1 loss pre-folded into w_ref[3] = (w3 - I):
    #   denoiser_out - comb = w0@c01 + w1@c02 + w2@f01 + (w3 - I)@comb + tbias
    r = jnp.dot(w_ref[0], c01_ref[0], preferred_element_type=jnp.float32)
    r = r + jnp.dot(w_ref[1], c02_ref[0], preferred_element_type=jnp.float32)
    r = r + jnp.dot(w_ref[2], f01, preferred_element_type=jnp.float32)
    r = r + jnp.dot(w_ref[3], comb, preferred_element_type=jnp.float32)
    r = r + tbias_ref[0]     # (C, 1) broadcast over lanes

    # F.l1_loss -> per-sample mean over C*H*W -> * p2_loss_weight -> batch mean,
    # all folded into the per-sample weight wl; emit a per-block partial sum.
    ps = jnp.sum(jnp.abs(r), keepdims=True) * wl
    loss_ref[...] = ps.reshape(1, 1, 1, 1)


# ----------------------------------------------------------------------------
# Wrapper
# ----------------------------------------------------------------------------
def _pick_hw_tile(hw, c, budget_bytes=12 * 1024 * 1024, max_lanes=8192):
    """Largest lane-dense HW tile dividing hw, keeping the double-buffered
    per-step footprint (4 image inputs + 1 output, f32) under budget (safe for
    v7x's smaller VMEM; v6e/v5e simply under-use their 128 MiB)."""
    if hw % 128 != 0:
        # TODO(synk): non-128-multiple spatial sizes fall back to one whole-HW
        # block (masked partial stores -> perf cliff, not a correctness issue).
        return hw
    per_lane_bytes = 2 * 5 * c * 4   # 2x buffers, 5 image arrays, f32
    t = (budget_bytes // per_lane_bytes) // 128 * 128
    t = max(128, min(hw, max_lanes, t))
    while hw % t != 0:
        t -= 128
    return t


def gaussian_diffusion_forward(c01, c02, f01, f02, t, bufs, w_conv, tbias):
    """Returns (scalar loss, combined_fine_img_t [NCHW])."""
    B, C, H, W = c01.shape
    HW = H * W

    # Free reshape (NCHW is already contiguous as (B, C, H*W)); no transposes.
    def flat(x):
        return x.astype(jnp.float32).reshape(B, C, HW)

    c01f, c02f, f01f, f02f = map(flat, (c01, c02, f01, f02))

    T = _pick_hw_tile(HW, C)
    n_hw = HW // T

    # O(B) per-sample schedule scalars -> SMEM (no O(N) expansion in HBM).
    sa = bufs.sqrt_alphas_cumprod[t]                        # (B,)
    soma = bufs.sqrt_one_minus_alphas_cumprod[t]            # (B,)
    lossw = bufs.p2_loss_weight[t] / float(C * HW * B)      # (B,)
    coef = jnp.stack([sa, soma, lossw], axis=1).astype(jnp.float32)   # (B, 3)

    # Denoiser weights; fold the loss target subtraction into the last one.
    w_all = w_conv.astype(jnp.float32).at[3].add(-jnp.eye(C, dtype=jnp.float32))
    tbias3 = tbias.astype(jnp.float32).reshape(B, C, 1)

    img_spec = pl.BlockSpec((1, C, T), lambda b, j: (b, 0, j))
    vmem_limit = int(min(48 * 1024 * 1024,
                         max(8 * 1024 * 1024, 4 * 5 * C * T * 4)))

    comb, loss_parts = pl.pallas_call(
        _gaussian_diffusion_kernel,
        out_shape=(
            jax.ShapeDtypeStruct((B, C, HW), jnp.float32),
            jax.ShapeDtypeStruct((B, n_hw, 1, 1), jnp.float32),
        ),
        grid=(B, n_hw),
        in_specs=[
            pl.BlockSpec(memory_space=pltpu.MemorySpace.SMEM),      # coef (B,3)
            pl.BlockSpec((1, C, 1), lambda b, j: (b, 0, 0)),        # tbias
            pl.BlockSpec((4, C, C), lambda b, j: (0, 0, 0)),        # weights (resident)
            img_spec,   # c01
            img_spec,   # c02
            img_spec,   # f01
            img_spec,   # f02
        ],
        out_specs=(
            pl.BlockSpec((1, C, T), lambda b, j: (b, 0, j)),        # comb (lane-dense)
            pl.BlockSpec((1, 1, 1, 1), lambda b, j: (b, j, 0, 0)),  # loss partials
        ),
        compiler_params=pltpu.CompilerParams(
            dimension_semantics=("parallel", "parallel"),
            vmem_limit_bytes=vmem_limit,
        ),
    )(coef, tbias3, w_all, c01f, c02f, f01f, f02f)

    # Tiny (B * n_hw)-element combine of per-block partial sums.
    loss = jnp.sum(loss_parts)
    return loss, comb.reshape(B, C, H, W)


# ----------------------------------------------------------------------------
# Pure-JAX reference (correctness check only)
# ----------------------------------------------------------------------------
def reference_forward(c01, c02, f01, f02, t, bufs, w_conv, tbias):
    B = c01.shape[0]
    sa = bufs.sqrt_alphas_cumprod[t].reshape(B, 1, 1, 1)
    soma = bufs.sqrt_one_minus_alphas_cumprod[t].reshape(B, 1, 1, 1)
    comb = sa * f02 + soma * f01
    out = (
        jnp.einsum("oc,bchw->bohw", w_conv[0], c01)
        + jnp.einsum("oc,bchw->bohw", w_conv[1], c02)
        + jnp.einsum("oc,bchw->bohw", w_conv[2], f01)
        + jnp.einsum("oc,bchw->bohw", w_conv[3], comb)
        + tbias.reshape(B, -1, 1, 1)
    )
    l1 = jnp.abs(out - comb)
    per_b = l1.reshape(B, -1).mean(axis=1)
    return (per_b * bufs.p2_loss_weight[t]).mean(), comb


# ----------------------------------------------------------------------------
if __name__ == "__main__":
    B, C, H, W = 2, 4, 16, 16
    bufs = DiffusionBuffers(timesteps=1000, p2_loss_weight_gamma=0.5)

    key = jax.random.PRNGKey(0)
    k1, k2, k3, k4, k5, k6, k7 = jax.random.split(key, 7)

    coarse_img_01 = jax.random.normal(k1, (B, C, H, W), dtype=jnp.float32)
    coarse_img_02 = jax.random.normal(k2, (B, C, H, W), dtype=jnp.float32)
    fine_img_01 = jax.random.normal(k3, (B, C, H, W), dtype=jnp.float32)
    fine_img_02 = jax.random.normal(k4, (B, C, H, W), dtype=jnp.float32)

    # t = torch.randint(0, num_timesteps, (b,))  (different RNG stream, same law)
    t = jax.random.randint(k5, (B,), 0, bufs.num_timesteps, dtype=jnp.int32)

    # Deterministic synthetic denoiser parameters (1x1 conv + time-emb bias).
    w_conv = 0.1 * jax.random.normal(k6, (4, C, C), dtype=jnp.float32)
    emb_dim = 16
    half = emb_dim // 2
    freqs = jnp.exp(-math.log(10000.0) * jnp.arange(half, dtype=jnp.float32) / half)
    args = t[:, None].astype(jnp.float32) * freqs[None, :]
    temb = jnp.concatenate([jnp.sin(args), jnp.cos(args)], axis=-1)  # (B, emb_dim)
    w_time = 0.1 * jax.random.normal(k7, (emb_dim, C), dtype=jnp.float32)
    tbias = (temb @ w_time).astype(jnp.float32)  # (B, C)

    loss, comb = gaussian_diffusion_forward(
        coarse_img_01, coarse_img_02, fine_img_01, fine_img_02, t, bufs, w_conv, tbias
    )
    loss = jax.block_until_ready(loss)
    comb = jax.block_until_ready(comb)

    ref_loss, ref_comb = reference_forward(
        coarse_img_01, coarse_img_02, fine_img_01, fine_img_02, t, bufs, w_conv, tbias
    )
    assert abs(float(loss) - float(ref_loss)) <= 1e-3 * (abs(float(ref_loss)) + 1.0), (
        float(loss),
        float(ref_loss),
    )
    assert np.allclose(np.asarray(comb), np.asarray(ref_comb), atol=1e-5, rtol=1e-5)

    print("KERNEL_OK")
</pallas_src>

<mosaic_0001>
module attributes {stable_mosaic.version = 11 : i64} {
  func.func @_gaussian_diffusion_kernel(%arg0: i32, %arg1: i32, %arg2: memref<2x3xf32, #tpu.memory_space<smem>>, %arg3: memref<1x4x1xf32, #tpu.memory_space<vmem>>, %arg4: memref<4x4x4xf32, #tpu.memory_space<vmem>>, %arg5: memref<1x4x256xf32, #tpu.memory_space<vmem>>, %arg6: memref<1x4x256xf32, #tpu.memory_space<vmem>>, %arg7: memref<1x4x256xf32, #tpu.memory_space<vmem>>, %arg8: memref<1x4x256xf32, #tpu.memory_space<vmem>>, %arg9: memref<1x4x256xf32, #tpu.memory_space<vmem>>, %arg10: memref<1x1x1x1xf32, #tpu.memory_space<vmem>>) attributes {dimension_semantics = [#tpu.dimension_semantics<parallel>, #tpu.dimension_semantics<parallel>], iteration_bounds = array<i64: 2, 1>, scalar_prefetch = 0 : i64, scratch_operands = 0 : i64, tpu.core_type = #tpu.core_type<tc>, window_params = [{transform_indices = @transform_0, window_bounds = array<i64: 2, 3>}, {transform_indices = @transform_1, window_bounds = array<i64: 1, 4, 1>}, {pipeline_mode = #tpu.pipeline_mode<synchronous>, transform_indices = @transform_2, window_bounds = array<i64: 4, 4, 4>}, {transform_indices = @transform_3, window_bounds = array<i64: 1, 4, 256>}, {transform_indices = @transform_4, window_bounds = array<i64: 1, 4, 256>}, {transform_indices = @transform_5, window_bounds = array<i64: 1, 4, 256>}, {transform_indices = @transform_6, window_bounds = array<i64: 1, 4, 256>}, {transform_indices = @transform_7, window_bounds = array<i64: 1, 4, 256>}, {transform_indices = @transform_8, window_bounds = array<i64: 1, 1, 1, 1>}]} {
    %0 = arith.index_cast %arg0 : i32 to index
    %c0 = arith.constant 0 : index
    %1 = memref.load %arg2[%0, %c0] : memref<2x3xf32, #tpu.memory_space<smem>>
    %2 = arith.index_cast %arg0 : i32 to index
    %c1 = arith.constant 1 : index
    %3 = memref.load %arg2[%2, %c1] : memref<2x3xf32, #tpu.memory_space<smem>>
    %4 = arith.index_cast %arg0 : i32 to index
    %c2 = arith.constant 2 : index
    %5 = memref.load %arg2[%4, %c2] : memref<2x3xf32, #tpu.memory_space<smem>>
    %c0_0 = arith.constant 0 : index
    %c0_1 = arith.constant 0 : index
    %c0_2 = arith.constant 0 : index
    %6 = vector.load %arg7[%c0_0, %c0_1, %c0_2] : memref<1x4x256xf32, #tpu.memory_space<vmem>>, vector<1x4x256xf32>
    %7 = vector.shape_cast %6 : vector<1x4x256xf32> to vector<4x256xf32>
    %c0_3 = arith.constant 0 : index
    %c0_4 = arith.constant 0 : index
    %c0_5 = arith.constant 0 : index
    %8 = vector.load %arg8[%c0_3, %c0_4, %c0_5] : memref<1x4x256xf32, #tpu.memory_space<vmem>>, vector<1x4x256xf32>
    %9 = vector.shape_cast %8 : vector<1x4x256xf32> to vector<4x256xf32>
    %10 = vector.broadcast %1 : f32 to vector<4x256xf32>
    %11 = arith.mulf %10, %9 : vector<4x256xf32>
    %12 = vector.broadcast %3 : f32 to vector<4x256xf32>
    %13 = arith.mulf %12, %7 : vector<4x256xf32>
    %14 = arith.addf %11, %13 : vector<4x256xf32>
    %c0_6 = arith.constant 0 : index
    %c0_7 = arith.constant 0 : index
    %c0_8 = arith.constant 0 : index
    %15 = vector.load %arg9[%c0_6, %c0_7, %c0_8] : memref<1x4x256xf32, #tpu.memory_space<vmem>>, vector<1x4x256xf32>
    %16 = vector.shape_cast %15 : vector<1x4x256xf32> to vector<4x256xf32>
    %17 = vector.shape_cast %14 : vector<4x256xf32> to vector<1x4x256xf32>
    tpu.vector_store %arg9[%c0_6, %c0_7, %c0_8], %17 {strides = array<i32>} : memref<1x4x256xf32, #tpu.memory_space<vmem>>, vector<1x4x256xf32>,
    %c0_9 = arith.constant 0 : index
    %c0_10 = arith.constant 0 : index
    %c0_11 = arith.constant 0 : index
    %18 = vector.load %arg4[%c0_9, %c0_10, %c0_11] : memref<4x4x4xf32, #tpu.memory_space<vmem>>, vector<1x4x4xf32>
    %19 = vector.shape_cast %18 : vector<1x4x4xf32> to vector<4x4xf32>
    %c0_12 = arith.constant 0 : index
    %c0_13 = arith.constant 0 : index
    %c0_14 = arith.constant 0 : index
    %20 = vector.load %arg5[%c0_12, %c0_13, %c0_14] : memref<1x4x256xf32, #tpu.memory_space<vmem>>, vector<1x4x256xf32>
    %21 = vector.shape_cast %20 : vector<1x4x256xf32> to vector<4x256xf32>
    %cst = arith.constant dense<0.000000e+00> : vector<4x256xf32>
    %22 = tpu.matmul %19, %21, %cst {dimension_numbers = #tpu.dot_dimension_numbers<[1], [0], [0], [1], [0, 0, 1, 1], [], []>} : vector<4x4xf32>, vector<4x256xf32>, vector<4x256xf32> -> vector<4x256xf32>
    %c1_15 = arith.constant 1 : index
    %c0_16 = arith.constant 0 : index
    %c0_17 = arith.constant 0 : index
    %23 = vector.load %arg4[%c1_15, %c0_16, %c0_17] : memref<4x4x4xf32, #tpu.memory_space<vmem>>, vector<1x4x4xf32>
    %24 = vector.shape_cast %23 : vector<1x4x4xf32> to vector<4x4xf32>
    %c0_18 = arith.constant 0 : index
    %c0_19 = arith.constant 0 : index
    %c0_20 = arith.constant 0 : index
    %25 = vector.load %arg6[%c0_18, %c0_19, %c0_20] : memref<1x4x256xf32, #tpu.memory_space<vmem>>, vector<1x4x256xf32>
    %26 = vector.shape_cast %25 : vector<1x4x256xf32> to vector<4x256xf32>
    %cst_21 = arith.constant dense<0.000000e+00> : vector<4x256xf32>
    %27 = tpu.matmul %24, %26, %cst_21 {dimension_numbers = #tpu.dot_dimension_numbers<[1], [0], [0], [1], [0, 0, 1, 1], [], []>} : vector<4x4xf32>, vector<4x256xf32>, vector<4x256xf32> -> vector<4x256xf32>
    %28 = arith.addf %22, %27 : vector<4x256xf32>
    %c2_22 = arith.constant 2 : index
    %c0_23 = arith.constant 0 : index
    %c0_24 = arith.constant 0 : index
    %29 = vector.load %arg4[%c2_22, %c0_23, %c0_24] : memref<4x4x4xf32, #tpu.memory_space<vmem>>, vector<1x4x4xf32>
    %30 = vector.shape_cast %29 : vector<1x4x4xf32> to vector<4x4xf32>
    %cst_25 = arith.constant dense<0.000000e+00> : vector<4x256xf32>
    %31 = tpu.matmul %30, %7, %cst_25 {dimension_numbers = #tpu.dot_dimension_numbers<[1], [0], [0], [1], [0, 0, 1, 1], [], []>} : vector<4x4xf32>, vector<4x256xf32>, vector<4x256xf32> -> vector<4x256xf32>
    %32 = arith.addf %28, %31 : vector<4x256xf32>
    %c3 = arith.constant 3 : index
    %c0_26 = arith.constant 0 : index
    %c0_27 = arith.constant 0 : index
    %33 = vector.load %arg4[%c3, %c0_26, %c0_27] : memref<4x4x4xf32, #tpu.memory_space<vmem>>, vector<1x4x4xf32>
    %34 = vector.shape_cast %33 : vector<1x4x4xf32> to vector<4x4xf32>
    %cst_28 = arith.constant dense<0.000000e+00> : vector<4x256xf32>
    %35 = tpu.matmul %34, %14, %cst_28 {dimension_numbers = #tpu.dot_dimension_numbers<[1], [0], [0], [1], [0, 0, 1, 1], [], []>} : vector<4x4xf32>, vector<4x256xf32>, vector<4x256xf32> -> vector<4x256xf32>
    %36 = arith.addf %32, %35 : vector<4x256xf32>
    %c0_29 = arith.constant 0 : index
    %c0_30 = arith.constant 0 : index
    %c0_31 = arith.constant 0 : index
    %37 = vector.load %arg3[%c0_29, %c0_30, %c0_31] : memref<1x4x1xf32, #tpu.memory_space<vmem>>, vector<1x4x1xf32>
    %38 = vector.shape_cast %37 : vector<1x4x1xf32> to vector<4x1xf32>
    %39 = vector.broadcast %38 : vector<4x1xf32> to vector<4x256xf32>
    %40 = arith.addf %36, %39 : vector<4x256xf32>
    %41 = math.absf %40 : vector<4x256xf32>
    %42 = vector.shape_cast %41 : vector<4x256xf32> to vector<1x4x256xf32>
    %cst_32 = arith.constant dense<0.000000e+00> : vector<1xf32>
    %43 = vector.multi_reduction <add>, %42, %cst_32 [1, 2] : vector<1x4x256xf32> to vector<1xf32>
    %44 = vector.shape_cast %43 : vector<1xf32> to vector<1x1x1xf32>
    %45 = vector.extract %44[0, 0, 0] : f32 from vector<1x1x1xf32>
    %46 = vector.broadcast %45 : f32 to vector<1x1xf32>
    %47 = vector.broadcast %5 : f32 to vector<1x1xf32>
    %48 = arith.mulf %46, %47 : vector<1x1xf32>
    %49 = vector.shape_cast %48 : vector<1x1xf32> to vector<1x1x1x1xf32>
    %c0_33 = arith.constant 0 : index
    %c0_34 = arith.constant 0 : index
    %c0_35 = arith.constant 0 : index
    %c0_36 = arith.constant 0 : index
    %50 = vector.load %arg10[%c0_33, %c0_34, %c0_35, %c0_36] : memref<1x1x1x1xf32, #tpu.memory_space<vmem>>, vector<1x1x1x1xf32>
    tpu.vector_store %arg10[%c0_33, %c0_34, %c0_35, %c0_36], %49 {strides = array<i32>} : memref<1x1x1x1xf32, #tpu.memory_space<vmem>>, vector<1x1x1x1xf32>,
    return
  }
  func.func @transform_0(%arg0: i32, %arg1: i32) -> (i32, i32) {
    %c0_i32 = arith.constant 0 : i32
    %c0_i32_0 = arith.constant 0 : i32
    %c0_i32_1 = arith.constant 0 : i32
    return %c0_i32, %c0_i32_0 : i32, i32
  }
  func.func @transform_1(%arg0: i32, %arg1: i32) -> (i32, i32, i32) {
    %c0_i32 = arith.constant 0 : i32
    %c0_i32_0 = arith.constant 0 : i32
    %c0_i32_1 = arith.constant 0 : i32
    return %arg0, %c0_i32, %c0_i32_0 : i32, i32, i32
  }
  func.func @transform_2(%arg0: i32, %arg1: i32) -> (i32, i32, i32) {
    %c0_i32 = arith.constant 0 : i32
    %c0_i32_0 = arith.constant 0 : i32
    %c0_i32_1 = arith.constant 0 : i32
    %c0_i32_2 = arith.constant 0 : i32
    return %c0_i32, %c0_i32_0, %c0_i32_1 : i32, i32, i32
  }
  func.func @transform_3(%arg0: i32, %arg1: i32) -> (i32, i32, i32) {
    %c0_i32 = arith.constant 0 : i32
    %c0_i32_0 = arith.constant 0 : i32
    return %arg0, %c0_i32, %arg1 : i32, i32, i32
  }
  func.func @transform_4(%arg0: i32, %arg1: i32) -> (i32, i32, i32) {
    %c0_i32 = arith.constant 0 : i32
    %c0_i32_0 = arith.constant 0 : i32
    return %arg0, %c0_i32, %arg1 : i32, i32, i32
  }
  func.func @transform_5(%arg0: i32, %arg1: i32) -> (i32, i32, i32) {
    %c0_i32 = arith.constant 0 : i32
    %c0_i32_0 = arith.constant 0 : i32
    return %arg0, %c0_i32, %arg1 : i32, i32, i32
  }
  func.func @transform_6(%arg0: i32, %arg1: i32) -> (i32, i32, i32) {
    %c0_i32 = arith.constant 0 : i32
    %c0_i32_0 = arith.constant 0 : i32
    return %arg0, %c0_i32, %arg1 : i32, i32, i32
  }
  func.func @transform_7(%arg0: i32, %arg1: i32) -> (i32, i32, i32) {
    %c0_i32 = arith.constant 0 : i32
    %c0_i32_0 = arith.constant 0 : i32
    return %arg0, %c0_i32, %arg1 : i32, i32, i32
  }
  func.func @transform_8(%arg0: i32, %arg1: i32) -> (i32, i32, i32, i32) {
    %c0_i32 = arith.constant 0 : i32
    %c0_i32_0 = arith.constant 0 : i32
    %c0_i32_1 = arith.constant 0 : i32
    return %arg0, %arg1, %c0_i32, %c0_i32_0 : i32, i32, i32, i32
  }
}

</mosaic_0001>

<bundles_post_ra>
// kernel: tpu_custom_call.1
= control target key start
LH: loop header
LB: loop body
LE: loop exit
PB: predicated region body
PF: predicated region fallthrough
CT: control target
= control target key end

     0   :  { %s1826_s0 = inlined_call_operand.hbm [shape: f32[2,3], index: 0, kind: input, shape index: {}]   ;;  %s1827_s1 = inlined_call_operand.vmem [shape: f32[2,4,1], index: 1, kind: input, shape index: {}]   ;;  %s1828_s2 = inlined_call_operand.hbm [shape: f32[4,4,4], index: 2, kind: input, shape index: {}]   ;;  %s1829_s3 = inlined_call_operand.hbm [shape: f32[2,4,256], index: 3, kind: input, shape index: {}]   ;;  %s1830_s4 = inlined_call_operand.vmem [shape: f32[2,4,256], index: 4, kind: input, shape index: {}]   ;;  %s1831_s5 = inlined_call_operand.hbm [shape: f32[2,4,256], index: 5, kind: input, shape index: {}]   ;;  %s1832_s6 = inlined_call_operand.hbm [shape: f32[2,4,256], index: 6, kind: input, shape index: {}]   ;;  %s1833_s7 = inlined_call_operand.hbm [shape: f32[2,4,256], index: 7, kind: output, shape index: {0}]   ;;  %s1834_s8 = inlined_call_operand.vmem [shape: f32[2,1,1,1], index: 8, kind: output, shape index: {1}]  }
   0x1   :  { %1843 = sst [smem:[#allocation23_spill]] %s1826_s0 }
   0x2   :  { %1844 = sst [smem:[#allocation24_spill]] %s1828_s2 }
   0x3   :  { %1845 = sst [smem:[#allocation25_spill]] %s1829_s3 }
   0x4   :  { %14 = vsyncpa [#allocation5], 0 }
   0x5   :  { %15 = vsyncpa [#allocation3], 0 }
   0x6   :  { %16 = vsyncpa [#allocation8], 0 }
   0x7   :  { %18 = vsyncpa [#allocation8 + $0x1], 0 }
   0x8   :  { %19 = vsyncpa [#allocation11], 0 }
   0x9   :  { %21 = vsyncpa [#allocation11 + $0x1], 0 }
   0xa   :  { %22 = vsyncpa [#allocation4], 0 }
   0xb   :  { %24 = vsyncpa [#allocation4 + $0x1], 0  ;;  %s1558_s27 = smov 0   ;;  %s1560_s28 = smov 0  }
   0xc   :  { %s1562_s29 = smov 0   ;;  %s1564_s30 = smov 0  }
   0xd   :  { %s1566_s9 = smov 0   ;;  %s1568_s10 = smov 0  }
   0xe LB: > { %1846 = sst [smem:[#allocation18_spill]] %s1497_s9  ;;  %s42_s11 = sadd.s32 1, %s1497_s9  ;;  %s1501_s10 = sphi %s1568_s10, %s30_s10   ;;  %s1497_s9 = sphi %s1566_s9, %s1873_s9   ;;  %s1493_s30 = sphi %s1564_s30, %s1877_s30   ;;  %s1489_s29 = sphi %s1562_s29, %s1876_s29   ;;  %s1485_s28 = sphi %s1560_s28, %s1875_s28   ;;  %s1481_s27 = sphi %s1558_s27, %s1874_s27  }
   0xf   : > { %1847 = sst [smem:[#allocation19_spill]] %s1501_s10  ;;  %s119_s12 = sadd.s32 1, %s1489_s29 }
  0x10   : > { %p44_p0 = scmp.ge.s32.totalorder %s42_s11, 2  ;;  %p126_p1 = scmp.ne.s32.totalorder %s1489_s29, %s1485_s28 }
  0x11   : > { %p127_p2 = scmp.eq.s32.totalorder %s1501_s10, 0  ;;  %p1226_p5 = scmp.lt.s32.totalorder %s1501_s10, 2 }
  0x12   : > { %s1879_s11 = smov (%p44_p0, %s42_s11), 0  ;;  %s325_s14 = sand.u32 1, %s1501_s10  }
  0x13   : > { %1848 = sst [smem:[#allocation20_spill]] %s1879_s11  ;;  %p128_p4 = por %p127_p2, %p126_p1 }
  0x14   : > { %s114_s13 = ssub.s32 %s1497_s9, %s1879_s11  ;;  %s1835_s15 = sand.u32 1, %s1489_s29  }
  0x15   : > { %p117_p6 = scmp.eq.s32.totalorder %s114_s13, 0  ;;  %s1605_s16 = sshll.u32 %s1497_s9, 7 }
  0x16   : > { %s1612_s18 = sshll.u32 %s1835_s15, 3  ;;  %s1850_s3 = sld [smem:[#allocation25_spill]] }
  0x17   : > { %s1608_s17 = scalar_select %p117_p6, %s1489_s29, %s119_s12  }
  0x18   : > { %p1618_p7 = pnand %p1226_p5, %p128_p4  ;;  %s329_s23 = scalar_lea.vmem [#allocation7], %s1612_s18 }
  0x19   : > { %1849 = sst [smem:[#allocation21_spill]] %s1608_s17  ;;  %s339_s24 = sshll.u32 %s329_s23, 4  ;;  %s340_s24 = int_to_ptr.vmem [resolvable:$true] %s339_s24 }
  0x1a   : > { %s1623_s25 = scalar_lea.sflag [#allocation8], %s325_s14  ;;  %p1842_p8 = pneg %p1618_p7 }
  0x1b   : > { %s1301_s26 = scalar_lea.vmem %s340_s24, 128  ;;  %s1503_s12 = smov [#allocation7]  }
  0x1c   : > { %s337_s21 = scalar_lea.hbm %s1850_s3, %s1605_s16  ;;  %p1302_p9 = scmp.ne.s32.totalorder %s340_s24, %s1301_s26 }
  0x1d   : > { %s1306_s13 = sshll.u32 %s1503_s12, 4  ;;  %s1307_s13 = int_to_ptr.vmem [resolvable:$false] %s1306_s13 }
  0x1e   : > { %p1304_p10 = pnand %p1302_p9, %p1842_p8  ;;  %s1308_s19 = scalar_lea.vmem %s1307_s13, 256 }
  0x1f   : > { %p1309_p12 = scmp.lt.s32.totalorder %s340_s24, %s1307_s13  ;;  %p1310_p13 = scmp.lt.s32.totalorder %s1308_s19, %s1301_s26 }
  0x20   : > { %p1305_p11 = pneg %p1304_p10 }
  0x21   : > { %p1311_p0 = por %p1310_p13, %p1309_p12 }
  0x23   : > { %p1312_p2 = pnand %p1311_p0, %p1305_p11 }
  0x25   : > { %1315 = shalt.err (!%p1312_p2)
}
  0x26   : > { %1213 = dma.hbm_to_vmem [thread:$0]  (!%p1618_p7), %s337_s21, 128, %s340_s24, %s1623_s25  }
  0x27   : > { %s1634_s14 = sadd.s32 4294967295, %s1501_s10   ;;  %s1138_s20 = sadd.s32 4294967294, %s1501_s10  }
  0x28   : > { %p132_p4 = scmp.ne.s32.totalorder %s1485_s28, %s1481_s27  ;;  %p1841_p5 = scmp.eq.s32.totalorder %s1634_s14, 0 }
  0x29   : > { %p242_p6 = scmp.eq.s32.totalorder %s1634_s14, 1  ;;  %p248_p9 = scmp.eq.s32.totalorder %s1138_s20, 1 }
  0x2a   : > { %p1139_p10 = scmp.ge.s32.totalorder %s1501_s10, 1  ;;  %p1644_p11 = por %p1841_p5, %p132_p4 }
  0x2b   : > { %p1651_p12 = por %p242_p6, %p126_p1  ;;  %p1655_p13 = por %p248_p9, %p132_p4 }
  0x2c   : > { %p283_p0 = scmp.lt.s32.totalorder %s1501_s10, 3  ;;  %s1504_s12 = smov [#allocation6]  }
  0x2d   : > { %s1854_s24 = scalar_select %p1655_p13, 1, 0 }
  0x2e   : > { %p1660_p2 = pnand %p1139_p10, %p283_p0  ;;  %s304_s13 = sshll.u32 %s1504_s12, 4  ;;  %s305_s13 = int_to_ptr.vmem [resolvable:$true] %s304_s13 }
  0x2f   : > { %1855 = sst [smem:[#allocation22_spill]] %s1854_s24  ;;  %s363_s11 = scalar_lea.vmem [#allocation9], %s1612_s18 }
  0x30   : > { %p1203_p3 = pneg %p1660_p2  ;;  %s373_s9 = sshll.u32 %s363_s11, 4  ;;  %s1677_s9 = int_to_ptr.vmem [resolvable:$true] %s373_s9 }
  0x31   : > { %s1505_s17 = smov [#allocation2]   ;;  %s1858_s0 = sld [smem:[#allocation23_spill]] }
  0x32   : > { %p1668_p1 = pnand %p1203_p3, %p1841_p5  ;;  %s1338_s24 = scalar_lea.vmem %s305_s13, 256 }
  0x33   : > { %p1339_p4 = scmp.ne.s32.totalorder %s305_s13, %s1338_s24  ;;  %p1346_p10 = scmp.lt.s32.totalorder %s305_s13, %s305_s13 }
  0x34   : > { %p1329_p3 = pneg %p1668_p1  ;;  %p1347_p0 = scmp.lt.s32.totalorder %s1338_s24, %s1338_s24 }
  0x36   : > { %p1341_p6 = pnand %p1339_p4, %p1329_p3  ;;  %p1348_p5 = por %p1347_p0, %p1346_p10 }
  0x37   : > { %1206 = dma.hbm_to_smem (!%p1668_p1), %s1858_s0, 32, %s1505_s17, [#allocation5]  }
  0x38   : > { %p1342_p9 = pneg %p1341_p6 }
  0x3a   : > { %p1349_p8 = pnand %p1348_p5, %p1342_p9 }
  0x3c   : > { %1352 = shalt.err (!%p1349_p8)
}
  0x3d   : > { %s1506_s11 = smov 64   ;;  %s1507_s15 = smov 4  }
  0x3e   : > { %s1859_s2 = sld [smem:[#allocation24_spill]]  ;;  %s1366_s20 = scalar_lea.vmem %s1677_s9, 128 }
  0x3f   : > { %p1367_p3 = scmp.ne.s32.totalorder %s1677_s9, %s1366_s20  ;;  %p1860_p4 = pneg %p1618_p7 }
  0x40   : > { %s1508_s24 = smov [#allocation9]  }
  0x41   : > { %p1369_p6 = pnand %p1367_p3, %p1860_p4  ;;  %s1371_s12 = sshll.u32 %s1508_s24, 4  ;;  %s1372_s12 = int_to_ptr.vmem [resolvable:$false] %s1371_s12 }
  0x42   : > { %s1373_s3 = scalar_lea.vmem %s1372_s12, 256  ;;  %p1374_p8 = scmp.lt.s32.totalorder %s1677_s9, %s1372_s12 }
  0x43   : > { %p1370_p10 = pneg %p1369_p6  ;;  %p1375_p5 = scmp.lt.s32.totalorder %s1373_s3, %s1366_s20 }
  0x44   : > { %1209 = dma.hbm_to_vmem [thread:$0]  (!%p1668_p1), %s1859_s2, 256, %s305_s13, [#allocation3], %s1506_s11, %s1506_s11, %s1507_s15  }
  0x45   : > { %p1376_p9 = por %p1375_p5, %p1374_p8 }
  0x47   : > { %p1377_p0 = pnand %p1376_p9, %p1370_p10 }
  0x49   : > { %1380 = shalt.err (!%p1377_p0)
}
  0x4a   : > { %s1861_s11 = scalar_lea.hbm %s1831_s5, %s1605_s16  ;;  %s392_s3 = scalar_lea.hbm %s1832_s6, %s1605_s16 }
  0x4b   : > { %1216 = dma.hbm_to_vmem [thread:$0]  (!%p1618_p7), %s1861_s11, 128, %s1677_s9, %s1623_s25  }
  0x4c   : > { %s384_s17 = scalar_lea.vmem [#allocation10], %s1612_s18  ;;  %s1862_s24 = sand.u32 1, %s1489_s29  }
  0x4d   : > { %s394_s20 = sshll.u32 %s384_s17, 4  ;;  %s381_s12 = scalar_lea.sflag [#allocation11], %s1862_s24  ;;  %s395_s20 = int_to_ptr.vmem [resolvable:$true] %s394_s20 }
  0x4e   : > { %s1394_s0 = scalar_lea.vmem %s395_s20, 128  ;;  %p1863_p3 = pmov %p1860_p4 }
  0x4f   : > { %p1395_p1 = scmp.ne.s32.totalorder %s395_s20, %s1394_s0  ;;  %s1509_s13 = smov [#allocation10]  }
  0x50   : > { %s1399_s19 = sshll.u32 %s1509_s13, 4  ;;  %s1400_s19 = int_to_ptr.vmem [resolvable:$false] %s1399_s19 }
  0x51   : > { %p1397_p4 = pnand %p1395_p1, %p1863_p3  ;;  %s1401_s2 = scalar_lea.vmem %s1400_s19, 256 }
  0x52   : > { %p1402_p10 = scmp.lt.s32.totalorder %s395_s20, %s1400_s19  ;;  %p1403_p8 = scmp.lt.s32.totalorder %s1401_s2, %s1394_s0 }
  0x53   : > { %p1398_p6 = pneg %p1397_p4 }
  0x54   : > { %p1404_p5 = por %p1403_p8, %p1402_p10 }
  0x56   : > { %p1405_p9 = pnand %p1404_p5, %p1398_p6 }
  0x58   : > { %1408 = shalt.err (!%p1405_p9)
}
  0x59   : > { %1219 = dma.hbm_to_vmem [thread:$0]  (!%p1618_p7), %s392_s3, 128, %s395_s20, %s381_s12  }
  0x5a   : > { %403 = sbr.rel (%p1660_p2) target bundleno = 533 (0x215), region = 48  ;;  %p1864_p0 = scmp.eq.s32.totalorder (!%p1660_p2), %s1634_s14, 0 }
  0x5f   : > { %1460 = dma.done.wait (%p1864_p0), [#allocation5], 32   ;;  %p1865_p1 = pmov %p1864_p0 }
  0x60   : > { %p1866_p3 = pmov %p1864_p0 }
  0x61   : > { %1462 = vsyncadd (%p1865_p1), [#allocation5], 4294967264 }
  0x62   : > { %1464 = dma.done.wait (%p1866_p3), [#allocation3], 256   ;;  %p1867_p4 = pmov %p1864_p0 }
  0x63   : > { %s413_s0 = sand.u32 1, %s1634_s14   ;;  %s1730_s2 = sand.u32 1, %s1485_s28  }
  0x64   : > { %1466 = vsyncadd (%p1867_p4), [#allocation3], 4294967040  ;;  %s1733_s9 = sshll.u32 %s1730_s2, 3  ;;  %s414_s16 = scalar_lea.sflag [#allocation8], %s413_s0 }
  0x65   : > { %s417_s18 = scalar_lea.vmem [#allocation7], %s1733_s9 }
  0x66   : > { %1468 = dma.done.wait (%p1644_p11), %s414_s16, 256  }
  0x67   : > { %1470 = vsyncadd (%p1644_p11), %s414_s16, 4294967040  ;;  %s426_s22 = scalar_lea.vmem [#allocation9], %s1733_s9  ;;  %s432_s25 = scalar_lea.sflag [#allocation11], %s1730_s2 }
  0x68   : > { %s435_s14 = scalar_lea.vmem [#allocation10], %s1733_s9 }
  0x69   : > { %1472 = dma.done.wait (%p1644_p11), %s432_s25, 128  }
  0x6a   : > { %1474 = vsyncadd (%p1644_p11), %s432_s25, 4294967168 }
  0x6b   : > { %440 = sfence }
  0x6c   : > { %p498_p7 = scmp.lt.s32.totalorder %s1493_s30, 1  ;;  %vm547_vm0 = vcmask 1043456   ;;  %v537_v0 = vld [vmem:[%s417_s18] sm:$0xff]  ;;  %v1510_v1 = vmov 0.0   ;;  %s1749_s26 = sshll.u32 %s1493_s30, 7  ;;  %vm543_vm1 = vcmask 31744  }
  0x6d   : > { %616 = vmatprep.mubr.f32.mxu0 %v1510_v1  ;;  %v624_v2 = vcombine.high %v537_v0, %v537_v0  ;;  %696 = vmatprep.mubr.f32.mxu1 %v1510_v1  ;;  %v536_v3 = vld [vmem:[#allocation6] sm:$0xf]  ;;  %s524_s23 = sadd.s32 1, %s1749_s26  ;;  %s523_s11 = sld [smem:[#allocation2 + %s1749_s26]]  ;;  %v1511_v4 = vmov 0   ;;  %v529_v9 = vld [vmem:[%s435_s14] sm:$0xff] }
  0x6e   : > { %s1881_s30 = smov (!%p498_p7, %s1493_s30), 1  ;;  %1284 = vset.pattern.permute.xlu0 %v1511_v4  ;;  %s525_s10 = sld [smem:[#allocation2 + %s524_s23]]  ;;  %v528_v6 = vld [vmem:[%s426_s22] sm:$0xff] }
  0x6f   : > { %1166 = vmatprep.subr.msk.mxu1 %vm547_vm0, %v624_v2  ;;  %s1183_s15 = sshll.u32 %s1881_s30, 3  ;;  %s1159_s24 = sshll.u32 %s1881_s30, 2  ;;  %v706_v8 = vcombine.high %v528_v6, %v528_v6  ;;  %v539_v11 = vld [vmem:[#allocation6 + $0x4] sm:$0xf]  ;;  %v704_v16 = vld [vmem:[#allocation6 + $0x8] sm:$0xf] }
  0x70   : > { %1167 = vmatpush1.msk.msra.mxu1 %vm547_vm0, %v537_v0  ;;  %s511_s20 = scalar_lea.vmem %s1830_s4, %s1183_s15  ;;  %s501_s19 = scalar_lea.vmem %s1827_s1, %s1159_s24  ;;  %v788_v19 = vld [vmem:[#allocation6 + $0xc] sm:$0xf] }
  0x71   : > { %1168 = vmatmul.mubr.msk.f32.vlgmr.msra.gmra.mxu1 %vm543_vm1, %v536_v3  ;;  %v540_v5 = vld [vmem:[%s511_s20] sm:$0xff]  ;;  %s489_s0 = scalar_lea.vmem [#allocation12], %s1733_s9  ;;  %s919_s25 = scalar_lea.hbm %s1833_s7, %s1749_s26 }
  0x72   : > { %862 = vmatprep.mubr.f32.mxu1 %v1510_v1  ;;  %v542_v7 = vcombine.high %v540_v5, %v540_v5  ;;  %v871_v10 = vld [vmem:[%s501_s19] sm:$0xf]  ;;  %s921_s16 = sshll.u32 %s489_s0, 4  ;;  %s899_s14 = scalar_lea.sflag [#allocation4], %s1730_s2  ;;  %s922_s16 = int_to_ptr.vmem [resolvable:$true] %s921_s16 }
  0x73   : > { %874 = vperm.xlu0 %1284, %v871_v10   ;;  %v530_v12 = vstv %s523_s11  ;;  %s1409_s23 = scalar_lea.vmem %s922_s16, 128  ;;  %s1512_s11 = smov [#allocation12]  }
  0x74   : > { %1163 = vmatprep.subr.msk.mxu0 %vm547_vm0, %v542_v7  ;;  %v532_v13 = vstv %s525_s10  ;;  %v531_v14 = vmul.f32 %v530_v12, %v529_v9  ;;  %p1410_p11 = scmp.ne.s32.totalorder %s922_s16, %s1409_s23  ;;  %s1413_s15 = sshll.u32 %s1512_s11, 4  ;;  %s1414_s15 = int_to_ptr.vmem [resolvable:$false] %s1413_s15 }
  0x75   : > { %1164 = vmatpush1.msk.msra.mxu0 %vm547_vm0, %v540_v5  ;;  %v533_v15 = vmul.f32 %v532_v13, %v528_v6  ;;  %s1415_s10 = scalar_lea.vmem %s1414_s15, 256  ;;  %p1416_p10 = scmp.lt.s32.totalorder %s922_s16, %s1414_s15 }
  0x76   : > { %1165 = vmatmul.mubr.msk.f32.vlgmr.msra.gmra.mxu0 %vm543_vm1, %v539_v11  ;;  %1169 = vmatprep.subr.msk.mxu0 %vm547_vm0, %v706_v8  ;;  %p1411_p2 = pnand %p1410_p11, %p1651_p12  ;;  %p1417_p8 = scmp.lt.s32.totalorder %s1415_s10, %s1409_s23 }
  0x77   : > { %1170 = vmatpush1.msk.msra.mxu0 %vm547_vm0, %v528_v6  ;;  %778 = vmatprep.mubr.f32.mxu0 %v1510_v1  ;;  %v534_v17 = vadd.f32 %v533_v15, %v531_v14 }
  0x78   : > { %p1412_p6 = pneg %p1411_p2  ;;  %p1418_p5 = por %p1417_p8, %p1416_p10 }
  0x79   : > { %v790_v18 = vcombine.high %v534_v17, %v534_v17  ;;  %535 = vst [vmem:[%s489_s0] sm:$0xff] %v534_v17 }
  0x7a   : > { %1171 = vmatmul.mubr.msk.f32.vlgmr.msra.gmra.mxu0 %vm543_vm1, %v704_v16  ;;  %p1419_p9 = pnand %p1418_p5, %p1412_p6 }
  0x7b   : > { %1172 = vmatprep.subr.msk.mxu1 %vm547_vm0, %v790_v18 }
  0x7c   : > { %1173 = vmatpush1.msk.msra.mxu1 %vm547_vm0, %v534_v17 }
  0x7d   : > { %1174 = vmatmul.mubr.msk.f32.vlgmr.msra.gmra.mxu1 %vm543_vm1, %v788_v19 }
  0xee   : > { %v875_v31 = vpop.permute.xlu0 %874 }
 0x131   : > { %v698_v20 = vpop.f32.mrf.mxu1 }
 0x133   : > { %v700_v23 = vpop.f32.mrf.mxu1 }
 0x136   : > { %v618_v21 = vpop.f32.mrf.mxu0 }
 0x137   : > { %v699_v24 = vadd.f32 %v698_v20, %v618_v21 }
 0x138   : > { %v620_v22 = vpop.f32.mrf.mxu0 }
 0x139   : > { %v701_v26 = vadd.f32 %v700_v23, %v620_v22 }
 0x13a   : > { %v780_v25 = vpop.f32.mrf.mxu0 }
 0x13b   : > { %v785_v27 = vadd.f32 %v780_v25, %v699_v24 }
 0x13c   : > { %v782_v28 = vpop.f32.mrf.mxu0 }
 0x13d   : > { %v786_v29 = vadd.f32 %v782_v28, %v701_v26  ;;  %v864_v30 = vpop.f32.mrf.mxu1 }
 0x13e   : > { %v869_v32 = vadd.f32 %v864_v30, %v785_v27 }
 0x13f   : > { %v866_v33 = vpop.f32.mrf.mxu1 }
 0x140   : > { %v870_v34 = vadd.f32 %v866_v33, %v786_v29  ;;  %v877_v35 = vadd.f32 %v875_v31, %v869_v32 }
 0x142   : > { %v878_v36 = vadd.f32 %v875_v31, %v870_v34  ;;  %v879_v37 = vand.u32 2147483647, %v877_v35 }
 0x144   : > { %v880_v38 = vand.u32 2147483647, %v878_v36  ;;  %v881_v39 = vsel %vm547_vm0, %v879_v37, 0.0 }
 0x146   : > { %v882_v40 = vsel %vm547_vm0, %v880_v38, 0.0 }
 0x147   : > { %v883_v41 = vadd.f32 %v882_v40, %v881_v39 }
 0x149   : > { %884 = vadd.xlane.f32.xlu0 %v883_v41 }
 0x14a   : > { %1422 = shalt.err (!%p1419_p9)
}
 0x14b   : > { %s1423_s9 = scalar_lea.hbm %s919_s25, 128  ;;  %s1427_s17 = scalar_lea.hbm %s1833_s7, 256 }
 0x14c   : > { %p1424_p0 = scmp.ne.s32.totalorder %s919_s25, %s1423_s9  ;;  %p1428_p4 = scmp.lt.s32.totalorder %s919_s25, %s1833_s7 }
 0x14d   : > { %p1429_p7 = scmp.lt.s32.totalorder %s1427_s17, %s1423_s9 }
 0x14e   : > { %p1425_p1 = pnand %p1424_p0, %p1651_p12 }
 0x14f   : > { %p1430_p11 = por %p1429_p7, %p1428_p4 }
 0x150   : > { %p1426_p3 = pneg %p1425_p1 }
 0x152   : > { %p1431_p2 = pnand %p1430_p11, %p1426_p3 }
 0x154   : > { %1434 = shalt.err (!%p1431_p2)
}
 0x155   : > { %1201 = dma.vmem_to_hbm [thread:$0]  (%p1651_p12), %s922_s16, 128, %s919_s25, %s899_s14   ;;  %vm896_vm2 = vcmask 0  }
 0x156   : > { %s526_s12 = sadd.s32 2, %s1749_s26  ;;  %s521_s22 = scalar_lea.vmem %s1834_s8, %s1881_s30 }
 0x157   : > { %s527_s13 = sld [smem:[#allocation2 + %s526_s12]] }
 0x15d   : > { %v894_v49 = vstv %s527_s13 }
 0x1d2   : > { %v885_v42 = vpop.xlane.xlu0 %884 }
 0x1d3   : > { %v886_v43 = vrot.slane %v885_v42, 4 }
 0x1d5   : > { %v887_v44 = vadd.f32 %v886_v43, %v885_v42 }
 0x1d7   : > { %v888_v45 = vrot.slane %v887_v44, 2 }
 0x1d9   : > { %v889_v46 = vadd.f32 %v888_v45, %v887_v44 }
 0x1db   : > { %v890_v47 = vrot.slane %v889_v46, 1 }
 0x1dd   : > { %v891_v48 = vadd.f32 %v890_v47, %v889_v46 }
 0x1df   : > { %1185 = vpush %v891_v48 }
 0x210   : > { %s1186_s19 = spop %1185 }
 0x211   : > { %v893_v50 = vstv %s1186_s19 }
 0x212   : > { %v895_v51 = vmul.f32 %v894_v49, %v893_v50 }
 0x214   : > { %897 = vst.msk [vmem:[%s521_s22] sm:$0x1] %vm896_vm2, %v895_v51 }
 0x215 PF: > { %s1869_s16 = sld [smem:[#allocation19_spill]]  ;;  %s936_s25 = sand.u32 1, %s1481_s27  }
 0x216   : > { %s937_s26 = scalar_lea.sflag [#allocation4], %s936_s25 }
 0x21b   : > { %p1870_p12 = scmp.ge.s32.totalorder %s1869_s16, 2 }
 0x21d   : > { %p1221_p6 = pnand %p1870_p12, %p1655_p13 }
 0x21f   : > { %p1222_p10 = pneg %p1221_p6 }
 0x221   : > { %1476 = dma.done.wait (%p1222_p10), %s937_s26, 128  }
 0x222   : > { %1478 = vsyncadd (%p1222_p10), %s937_s26, 4294967168  ;;  %s30_s10 = sadd.s32 1, %s1869_s16   ;;  %s1871_s30 = sld [smem:[#allocation21_spill]] }
 0x223   : > { %p27_p8 = scmp.ge.s32.totalorder %s30_s10, 4   ;;  %s1872_s14 = sld [smem:[#allocation18_spill]] }
 0x224   : > { %s1873_s9 = sld [smem:[#allocation20_spill]]  ;;  %s1874_s27 = smov %s1485_s28 }
 0x225   : > { %s1875_s28 = smov %s1489_s29  ;;  %29 = sbr.rel (!%p27_p8) target bundleno = 14 (0xe), region = 148 }
 0x228   : > { %s1876_s29 = smov %s1871_s30 }
 0x229   : > { %s1877_s30 = smov %s1872_s14 }
 0x22a   :  { %951 = vsyncpa [#allocation3], 1 }
 0x22b   :  { %953 = vsyncpa [#allocation3 + $0x1], 1 }
 0x22c   :  { %954 = vsyncpa [#allocation8], 1 }
 0x22d   :  { %956 = vsyncpa [#allocation8 + $0x1], 1 }
 0x22e   :  { %957 = vsyncpa [#allocation11], 1 }
 0x22f   :  { %959 = vsyncpa [#allocation11 + $0x1], 1 }
 0x230   :  { %960 = vsyncpa [#allocation4], 1 }
 0x231   :  { %962 = vsyncpa [#allocation4 + $0x1], 1 }
 0x232   :  { %963 = vsyncpa [#allocation5], 1 }
 0x233   :  { %965 = vsyncpa [#allocation5 + $0x1], 1 }

</bundles_post_ra>
